<compile_context>
chip_gen: v7x
topology: tpu7x:2x2x1
jax: 0.10.0
libtpu: 0.0.40
codegen_flags: <defaults>
</compile_context>

<pallas_src>
import functools

import jax
import jax.numpy as jnp
from jax import lax
from jax.experimental import pallas as pl
from jax.experimental.pallas import tpu as pltpu


def lstm_net_kernel(x_ref, mats_ref, vecs_ref, out_ref, *, hidden_dim, seq_len):
    H = hidden_dim
    Bp = x_ref.shape[1]
    LANE = vecs_ref.shape[1]

    # Packed parameters (lane width LANE; g-gate columns already pre-scaled by 2).
    w_ih = vecs_ref[0:1, :]            # (1, LANE)
    b = vecs_ref[1:2, :]               # (1, LANE)  (b_ih + b_hh)
    b1 = vecs_ref[2:3, :]              # (1, LANE)
    b2 = vecs_ref[3:4, :]              # (1, LANE)
    w_hh = mats_ref[0:H, :]            # (H, LANE)
    w1 = mats_ref[H:2 * H, :]          # (H, LANE)
    w2 = mats_ref[2 * H:, :]           # (LANE, LANE)

    # ---- Hoisted input projection: computed once, outside the serial recurrence ----
    x = x_ref[...]                                   # (T, Bp)
    x_proj = x[:, :, None] * w_ih + b                # (T, Bp, LANE), lane-dense

    # Hoisted g-gate fixup constants: tanh(x) = 2*sigmoid(2x) - 1 (pre-scaled inputs).
    lane = lax.broadcasted_iota(jnp.int32, (Bp, LANE), 1)
    g_mask = (lane >= 2 * H) & (lane < 3 * H)
    g_scale = jnp.where(g_mask, 2.0, 1.0)            # (Bp, LANE)
    g_shift = jnp.where(g_mask, -1.0, 0.0)           # (Bp, LANE)

    h = jnp.zeros((Bp, H), jnp.float32)
    c = jnp.zeros((Bp, H), jnp.float32)

    # Fully unrolled recurrence (seq_len is a static Python int): one MXU dot + one
    # full-tile sigmoid (exp on EUP + vrcp) + a little VPU work per step.
    for t in range(seq_len):
        gates = x_proj[t] + jnp.dot(h, w_hh, preferred_element_type=jnp.float32)  # (Bp, LANE)
        sg = pl.reciprocal(1.0 + jnp.exp(-gates), approx=True)   # sigmoid on all lanes
        act = sg * g_scale + g_shift                             # g lanes -> tanh
        i = act[:, 0:H]
        f = act[:, H:2 * H]
        g = act[:, 2 * H:3 * H]
        o = act[:, 3 * H:4 * H]
        c = f * c + i * g
        h = o * jnp.tanh(c)                                      # single EUP tanh on (Bp,H)

    # dropout -> identity (inference); fc1 -> relu -> (dropout) -> fc2 -> sigmoid
    h1 = jnp.maximum(
        jnp.dot(h, w1, preferred_element_type=jnp.float32) + b1, 0.0)        # (Bp, LANE)
    logits = jnp.dot(h1, w2, preferred_element_type=jnp.float32) + b2        # (Bp, LANE)
    out_ref[...] = pl.reciprocal(1.0 + jnp.exp(-logits), approx=True)        # lane-dense vst


def lstm_net_forward(x_tb, params, *, hidden_dim, seq_len, out_dim=1):
    """x_tb: (T, B) float32. params: (w_ih, w_hh, b, w1, b1, w2, b2). Returns (B, out_dim)."""
    w_ih, w_hh, b, w1, b1, w2, b2 = params
    T, B = x_tb.shape
    H = hidden_dim
    H4 = 4 * H
    LANE = max(H4, 128)                     # lane width for all packed params / output

    # Pad batch to a multiple of 8 sublanes.
    Bp = max(8, ((B + 7) // 8) * 8)
    x_pad = jnp.pad(x_tb, ((0, 0), (0, Bp - B)))

    # tanh(x) = 2*sigmoid(2x) - 1: pre-scale the g-gate columns [2H, 3H) by 2 so the
    # kernel needs only ONE full-tile sigmoid pass per recurrence step.
    g_scale = jnp.ones((1, H4), jnp.float32).at[:, 2 * H:3 * H].set(2.0)
    w_ih_s = w_ih * g_scale
    b_s = b * g_scale
    w_hh_s = w_hh * g_scale

    def pad_lanes(a):
        return jnp.pad(a, ((0, 0), (0, LANE - a.shape[1])))

    # Pack weight matrices into one lane-dense slab: [w_hh (H), w1 (H), w2 (LANE)] rows.
    w_hh_p = pad_lanes(w_hh_s)                                     # (H, LANE)
    w1_p = pad_lanes(w1)                                           # (H, LANE)
    w2_p = jnp.pad(w2, ((0, LANE - w2.shape[0]), (0, LANE - w2.shape[1])))  # (LANE, LANE)
    mats = jnp.concatenate([w_hh_p, w1_p, w2_p], axis=0)           # (2H + LANE, LANE)

    # Pack the small vectors into one slab: [w_ih, b, b1, b2] rows.
    vecs = jnp.concatenate(
        [pad_lanes(w_ih_s), pad_lanes(b_s), pad_lanes(b1), pad_lanes(b2)], axis=0)  # (4, LANE)

    args = (x_pad, mats, vecs)

    # Advisory cost estimate (latency-bound micro-kernel).
    flops = (T * (2 * Bp * H * LANE + 10 * Bp * LANE)        # recurrence dot + gate math
             + 2 * Bp * H * LANE + 2 * Bp * LANE * LANE      # fc1 + fc2
             + 4 * Bp * LANE)
    transcendentals = T * Bp * (2 * LANE + H) + 2 * Bp * LANE
    bytes_accessed = sum(int(a.size) * 4 for a in args) + Bp * LANE * 4

    kernel = functools.partial(lstm_net_kernel, hidden_dim=H, seq_len=seq_len)
    vmem = pl.BlockSpec(memory_space=pltpu.MemorySpace.VMEM)
    out_pad = pl.pallas_call(
        kernel,
        out_shape=jax.ShapeDtypeStruct((Bp, LANE), jnp.float32),
        in_specs=[vmem] * 3,
        out_specs=vmem,
        cost_estimate=pl.CostEstimate(flops=flops,
                                      transcendentals=transcendentals,
                                      bytes_accessed=bytes_accessed),
    )(*args)
    return out_pad[:B, :out_dim]


def reference_forward(x_tb, params, *, hidden_dim, seq_len):
    """Pure-JAX reference matching the PyTorch forward (eval mode, use_sigmoid=True)."""
    w_ih, w_hh, b, w1, b1, w2, b2 = params
    H = hidden_dim
    B = x_tb.shape[1]
    h = jnp.zeros((B, H), jnp.float32)
    c = jnp.zeros((B, H), jnp.float32)
    for t in range(seq_len):
        gates = x_tb[t][:, None] * w_ih + h @ w_hh + b
        i = jax.nn.sigmoid(gates[:, 0:H])
        f = jax.nn.sigmoid(gates[:, H:2 * H])
        g = jnp.tanh(gates[:, 2 * H:3 * H])
        o = jax.nn.sigmoid(gates[:, 3 * H:4 * H])
        c = f * c + i * g
        h = o * jnp.tanh(c)
    h1 = jnp.maximum(h @ w1 + b1, 0.0)
    return jax.nn.sigmoid(h1 @ w2 + b2)


if __name__ == "__main__":
    B, T, H, OUT = 2, 8, 32, 1          # batch=2, seq=8, hidden_dim=32, output_dim=1

    key = jax.random.PRNGKey(0)
    ks = jax.random.split(key, 10)
    bound = 1.0 / jnp.sqrt(jnp.float32(H))

    def u(k, shape):
        return jax.random.uniform(k, shape, jnp.float32, -bound, bound)

    # LSTM layer-0 params (PyTorch: weight_ih (4H,1), weight_hh (4H,H), biases (4H,)),
    # stored pre-transposed for right-multiplication; gate order [i, f, g, o].
    w_ih = u(ks[0], (1, 4 * H))                       # weight_ih_l0.T (input_size=1)
    w_hh = u(ks[1], (H, 4 * H))                       # weight_hh_l0.T
    b = u(ks[2], (1, 4 * H)) + u(ks[3], (1, 4 * H))   # bias_ih + bias_hh
    # fc1 / fc2 params, stored (in, out)
    w1 = u(ks[4], (H, H))
    b1 = u(ks[5], (1, H))
    w2 = u(ks[6], (H, OUT))
    b2 = u(ks[7], (1, OUT))
    params = (w_ih, w_hh, b, w1, b1, w2, b2)

    # data: (B, T, 1) batch_first like PyTorch -> time-major (T, B) for the kernel
    data = jax.random.normal(ks[8], (B, T, 1), jnp.float32)
    x_tb = jnp.transpose(data[:, :, 0], (1, 0))       # (T, B)

    out = lstm_net_forward(x_tb, params, hidden_dim=H, seq_len=T, out_dim=OUT)
    out = jax.block_until_ready(out)

    ref = reference_forward(x_tb, params, hidden_dim=H, seq_len=T)
    assert out.shape == (B, OUT)
    # Tolerance loosened vs. the pure-f32 version: the gate/output sigmoids use the
    # EUP approximate reciprocal (pl.reciprocal(..., approx=True)).
    assert jnp.allclose(out, ref, atol=2e-3, rtol=2e-3), (out, ref)

    # TODO(synk): nn.Dropout / LSTM inter-layer dropout are identity here (inference mode).
    print("KERNEL_OK")
</pallas_src>

<mosaic_0001>
module attributes {stable_mosaic.version = 11 : i64} {
  func.func @lstm_net_kernel(%arg0: memref<8x8xf32, #tpu.memory_space<vmem>>, %arg1: memref<192x128xf32, #tpu.memory_space<vmem>>, %arg2: memref<4x128xf32, #tpu.memory_space<vmem>>, %arg3: memref<8x128xf32, #tpu.memory_space<vmem>>) attributes {dimension_semantics = [], scalar_prefetch = 0 : i64, scratch_operands = 0 : i64, tpu.core_type = #tpu.core_type<tc>} {
    %c0 = arith.constant 0 : index
    %c0_0 = arith.constant 0 : index
    %0 = vector.load %arg2[%c0, %c0_0] : memref<4x128xf32, #tpu.memory_space<vmem>>, vector<1x128xf32>
    %c1 = arith.constant 1 : index
    %c0_1 = arith.constant 0 : index
    %1 = vector.load %arg2[%c1, %c0_1] : memref<4x128xf32, #tpu.memory_space<vmem>>, vector<1x128xf32>
    %c2 = arith.constant 2 : index
    %c0_2 = arith.constant 0 : index
    %2 = vector.load %arg2[%c2, %c0_2] : memref<4x128xf32, #tpu.memory_space<vmem>>, vector<1x128xf32>
    %c3 = arith.constant 3 : index
    %c0_3 = arith.constant 0 : index
    %3 = vector.load %arg2[%c3, %c0_3] : memref<4x128xf32, #tpu.memory_space<vmem>>, vector<1x128xf32>
    %c0_4 = arith.constant 0 : index
    %c0_5 = arith.constant 0 : index
    %4 = vector.load %arg1[%c0_4, %c0_5] : memref<192x128xf32, #tpu.memory_space<vmem>>, vector<32x128xf32>
    %c32 = arith.constant 32 : index
    %c0_6 = arith.constant 0 : index
    %5 = vector.load %arg1[%c32, %c0_6] : memref<192x128xf32, #tpu.memory_space<vmem>>, vector<32x128xf32>
    %c64 = arith.constant 64 : index
    %c0_7 = arith.constant 0 : index
    %6 = vector.load %arg1[%c64, %c0_7] : memref<192x128xf32, #tpu.memory_space<vmem>>, vector<128x128xf32>
    %c0_8 = arith.constant 0 : index
    %c0_9 = arith.constant 0 : index
    %7 = vector.load %arg0[%c0_8, %c0_9] : memref<8x8xf32, #tpu.memory_space<vmem>>, vector<8x8xf32>
    %8 = vector.shape_cast %7 : vector<8x8xf32> to vector<8x8x1xf32>
    %9 = vector.shape_cast %0 : vector<1x128xf32> to vector<1x1x128xf32>
    %10 = vector.broadcast %8 : vector<8x8x1xf32> to vector<8x8x128xf32>
    %11 = vector.broadcast %9 : vector<1x1x128xf32> to vector<8x8x128xf32>
    %12 = arith.mulf %10, %11 : vector<8x8x128xf32>
    %13 = vector.shape_cast %1 : vector<1x128xf32> to vector<1x1x128xf32>
    %14 = vector.broadcast %13 : vector<1x1x128xf32> to vector<8x8x128xf32>
    %15 = arith.addf %12, %14 : vector<8x8x128xf32>
    %16 = tpu.iota {dimensions = array<i32: 1>} : vector<8x128xi32>
    %c64_i32 = arith.constant 64 : i32
    %17 = vector.broadcast %c64_i32 : i32 to vector<8x128xi32>
    %18 = arith.cmpi sge, %16, %17 : vector<8x128xi32>
    %c96_i32 = arith.constant 96 : i32
    %19 = vector.broadcast %c96_i32 : i32 to vector<8x128xi32>
    %20 = arith.cmpi slt, %16, %19 : vector<8x128xi32>
    %21 = arith.andi %18, %20 : vector<8x128xi1>
    %cst = arith.constant 2.000000e+00 : f32
    %cst_10 = arith.constant 1.000000e+00 : f32
    %22 = vector.broadcast %cst : f32 to vector<8x128xf32>
    %23 = vector.broadcast %cst_10 : f32 to vector<8x128xf32>
    %24 = arith.select %21, %22, %23 : vector<8x128xi1>, vector<8x128xf32>
    %cst_11 = arith.constant -1.000000e+00 : f32
    %cst_12 = arith.constant 0.000000e+00 : f32
    %25 = vector.broadcast %cst_11 : f32 to vector<8x128xf32>
    %26 = vector.broadcast %cst_12 : f32 to vector<8x128xf32>
    %27 = arith.select %21, %25, %26 : vector<8x128xi1>, vector<8x128xf32>
    %cst_13 = arith.constant 0.000000e+00 : f32
    %28 = vector.broadcast %cst_13 : f32 to vector<8x32xf32>
    %cst_14 = arith.constant 0.000000e+00 : f32
    %29 = vector.broadcast %cst_14 : f32 to vector<8x32xf32>
    %30 = vector.extract_strided_slice %15 {offsets = [0, 0, 0], sizes = [1, 8, 128], strides = [1, 1, 1]} : vector<8x8x128xf32> to vector<1x8x128xf32>
    %31 = vector.shape_cast %30 : vector<1x8x128xf32> to vector<8x128xf32>
    %cst_15 = arith.constant dense<0.000000e+00> : vector<8x128xf32>
    %32 = tpu.matmul %28, %4, %cst_15 {dimension_numbers = #tpu.dot_dimension_numbers<[1], [0], [0], [1], [0, 0, 1, 1], [], []>} : vector<8x32xf32>, vector<32x128xf32>, vector<8x128xf32> -> vector<8x128xf32>
    %33 = arith.addf %31, %32 : vector<8x128xf32>
    %cst_16 = arith.constant 0.000000e+00 : f32
    %34 = vector.broadcast %cst_16 : f32 to vector<8x128xf32>
    %35 = arith.subf %34, %33 : vector<8x128xf32>
    %36 = math.exp %35 : vector<8x128xf32>
    %cst_17 = arith.constant 1.000000e+00 : f32
    %37 = vector.broadcast %cst_17 : f32 to vector<8x128xf32>
    %38 = arith.addf %37, %36 : vector<8x128xf32>
    %39 = tpu.reciprocal %38 {approx = true} : vector<8x128xf32> -> vector<8x128xf32>
    %40 = arith.mulf %39, %24 : vector<8x128xf32>
    %41 = arith.addf %40, %27 : vector<8x128xf32>
    %42 = vector.extract_strided_slice %41 {offsets = [0, 0], sizes = [8, 32], strides = [1, 1]} : vector<8x128xf32> to vector<8x32xf32>
    %43 = vector.extract_strided_slice %41 {offsets = [0, 32], sizes = [8, 32], strides = [1, 1]} : vector<8x128xf32> to vector<8x32xf32>
    %44 = vector.extract_strided_slice %41 {offsets = [0, 64], sizes = [8, 32], strides = [1, 1]} : vector<8x128xf32> to vector<8x32xf32>
    %45 = vector.extract_strided_slice %41 {offsets = [0, 96], sizes = [8, 32], strides = [1, 1]} : vector<8x128xf32> to vector<8x32xf32>
    %46 = arith.mulf %43, %29 : vector<8x32xf32>
    %47 = arith.mulf %42, %44 : vector<8x32xf32>
    %48 = arith.addf %46, %47 : vector<8x32xf32>
    %49 = math.tanh %48 : vector<8x32xf32>
    %50 = arith.mulf %45, %49 : vector<8x32xf32>
    %51 = vector.extract_strided_slice %15 {offsets = [1, 0, 0], sizes = [1, 8, 128], strides = [1, 1, 1]} : vector<8x8x128xf32> to vector<1x8x128xf32>
    %52 = vector.shape_cast %51 : vector<1x8x128xf32> to vector<8x128xf32>
    %cst_18 = arith.constant dense<0.000000e+00> : vector<8x128xf32>
    %53 = tpu.matmul %50, %4, %cst_18 {dimension_numbers = #tpu.dot_dimension_numbers<[1], [0], [0], [1], [0, 0, 1, 1], [], []>} : vector<8x32xf32>, vector<32x128xf32>, vector<8x128xf32> -> vector<8x128xf32>
    %54 = arith.addf %52, %53 : vector<8x128xf32>
    %cst_19 = arith.constant 0.000000e+00 : f32
    %55 = vector.broadcast %cst_19 : f32 to vector<8x128xf32>
    %56 = arith.subf %55, %54 : vector<8x128xf32>
    %57 = math.exp %56 : vector<8x128xf32>
    %cst_20 = arith.constant 1.000000e+00 : f32
    %58 = vector.broadcast %cst_20 : f32 to vector<8x128xf32>
    %59 = arith.addf %58, %57 : vector<8x128xf32>
    %60 = tpu.reciprocal %59 {approx = true} : vector<8x128xf32> -> vector<8x128xf32>
    %61 = arith.mulf %60, %24 : vector<8x128xf32>
    %62 = arith.addf %61, %27 : vector<8x128xf32>
    %63 = vector.extract_strided_slice %62 {offsets = [0, 0], sizes = [8, 32], strides = [1, 1]} : vector<8x128xf32> to vector<8x32xf32>
    %64 = vector.extract_strided_slice %62 {offsets = [0, 32], sizes = [8, 32], strides = [1, 1]} : vector<8x128xf32> to vector<8x32xf32>
    %65 = vector.extract_strided_slice %62 {offsets = [0, 64], sizes = [8, 32], strides = [1, 1]} : vector<8x128xf32> to vector<8x32xf32>
    %66 = vector.extract_strided_slice %62 {offsets = [0, 96], sizes = [8, 32], strides = [1, 1]} : vector<8x128xf32> to vector<8x32xf32>
    %67 = arith.mulf %64, %48 : vector<8x32xf32>
    %68 = arith.mulf %63, %65 : vector<8x32xf32>
    %69 = arith.addf %67, %68 : vector<8x32xf32>
    %70 = math.tanh %69 : vector<8x32xf32>
    %71 = arith.mulf %66, %70 : vector<8x32xf32>
    %72 = vector.extract_strided_slice %15 {offsets = [2, 0, 0], sizes = [1, 8, 128], strides = [1, 1, 1]} : vector<8x8x128xf32> to vector<1x8x128xf32>
    %73 = vector.shape_cast %72 : vector<1x8x128xf32> to vector<8x128xf32>
    %cst_21 = arith.constant dense<0.000000e+00> : vector<8x128xf32>
    %74 = tpu.matmul %71, %4, %cst_21 {dimension_numbers = #tpu.dot_dimension_numbers<[1], [0], [0], [1], [0, 0, 1, 1], [], []>} : vector<8x32xf32>, vector<32x128xf32>, vector<8x128xf32> -> vector<8x128xf32>
    %75 = arith.addf %73, %74 : vector<8x128xf32>
    %cst_22 = arith.constant 0.000000e+00 : f32
    %76 = vector.broadcast %cst_22 : f32 to vector<8x128xf32>
    %77 = arith.subf %76, %75 : vector<8x128xf32>
    %78 = math.exp %77 : vector<8x128xf32>
    %cst_23 = arith.constant 1.000000e+00 : f32
    %79 = vector.broadcast %cst_23 : f32 to vector<8x128xf32>
    %80 = arith.addf %79, %78 : vector<8x128xf32>
    %81 = tpu.reciprocal %80 {approx = true} : vector<8x128xf32> -> vector<8x128xf32>
    %82 = arith.mulf %81, %24 : vector<8x128xf32>
    %83 = arith.addf %82, %27 : vector<8x128xf32>
    %84 = vector.extract_strided_slice %83 {offsets = [0, 0], sizes = [8, 32], strides = [1, 1]} : vector<8x128xf32> to vector<8x32xf32>
    %85 = vector.extract_strided_slice %83 {offsets = [0, 32], sizes = [8, 32], strides = [1, 1]} : vector<8x128xf32> to vector<8x32xf32>
    %86 = vector.extract_strided_slice %83 {offsets = [0, 64], sizes = [8, 32], strides = [1, 1]} : vector<8x128xf32> to vector<8x32xf32>
    %87 = vector.extract_strided_slice %83 {offsets = [0, 96], sizes = [8, 32], strides = [1, 1]} : vector<8x128xf32> to vector<8x32xf32>
    %88 = arith.mulf %85, %69 : vector<8x32xf32>
    %89 = arith.mulf %84, %86 : vector<8x32xf32>
    %90 = arith.addf %88, %89 : vector<8x32xf32>
    %91 = math.tanh %90 : vector<8x32xf32>
    %92 = arith.mulf %87, %91 : vector<8x32xf32>
    %93 = vector.extract_strided_slice %15 {offsets = [3, 0, 0], sizes = [1, 8, 128], strides = [1, 1, 1]} : vector<8x8x128xf32> to vector<1x8x128xf32>
    %94 = vector.shape_cast %93 : vector<1x8x128xf32> to vector<8x128xf32>
    %cst_24 = arith.constant dense<0.000000e+00> : vector<8x128xf32>
    %95 = tpu.matmul %92, %4, %cst_24 {dimension_numbers = #tpu.dot_dimension_numbers<[1], [0], [0], [1], [0, 0, 1, 1], [], []>} : vector<8x32xf32>, vector<32x128xf32>, vector<8x128xf32> -> vector<8x128xf32>
    %96 = arith.addf %94, %95 : vector<8x128xf32>
    %cst_25 = arith.constant 0.000000e+00 : f32
    %97 = vector.broadcast %cst_25 : f32 to vector<8x128xf32>
    %98 = arith.subf %97, %96 : vector<8x128xf32>
    %99 = math.exp %98 : vector<8x128xf32>
    %cst_26 = arith.constant 1.000000e+00 : f32
    %100 = vector.broadcast %cst_26 : f32 to vector<8x128xf32>
    %101 = arith.addf %100, %99 : vector<8x128xf32>
    %102 = tpu.reciprocal %101 {approx = true} : vector<8x128xf32> -> vector<8x128xf32>
    %103 = arith.mulf %102, %24 : vector<8x128xf32>
    %104 = arith.addf %103, %27 : vector<8x128xf32>
    %105 = vector.extract_strided_slice %104 {offsets = [0, 0], sizes = [8, 32], strides = [1, 1]} : vector<8x128xf32> to vector<8x32xf32>
    %106 = vector.extract_strided_slice %104 {offsets = [0, 32], sizes = [8, 32], strides = [1, 1]} : vector<8x128xf32> to vector<8x32xf32>
    %107 = vector.extract_strided_slice %104 {offsets = [0, 64], sizes = [8, 32], strides = [1, 1]} : vector<8x128xf32> to vector<8x32xf32>
    %108 = vector.extract_strided_slice %104 {offsets = [0, 96], sizes = [8, 32], strides = [1, 1]} : vector<8x128xf32> to vector<8x32xf32>
    %109 = arith.mulf %106, %90 : vector<8x32xf32>
    %110 = arith.mulf %105, %107 : vector<8x32xf32>
    %111 = arith.addf %109, %110 : vector<8x32xf32>
    %112 = math.tanh %111 : vector<8x32xf32>
    %113 = arith.mulf %108, %112 : vector<8x32xf32>
    %114 = vector.extract_strided_slice %15 {offsets = [4, 0, 0], sizes = [1, 8, 128], strides = [1, 1, 1]} : vector<8x8x128xf32> to vector<1x8x128xf32>
    %115 = vector.shape_cast %114 : vector<1x8x128xf32> to vector<8x128xf32>
    %cst_27 = arith.constant dense<0.000000e+00> : vector<8x128xf32>
    %116 = tpu.matmul %113, %4, %cst_27 {dimension_numbers = #tpu.dot_dimension_numbers<[1], [0], [0], [1], [0, 0, 1, 1], [], []>} : vector<8x32xf32>, vector<32x128xf32>, vector<8x128xf32> -> vector<8x128xf32>
    %117 = arith.addf %115, %116 : vector<8x128xf32>
    %cst_28 = arith.constant 0.000000e+00 : f32
    %118 = vector.broadcast %cst_28 : f32 to vector<8x128xf32>
    %119 = arith.subf %118, %117 : vector<8x128xf32>
    %120 = math.exp %119 : vector<8x128xf32>
    %cst_29 = arith.constant 1.000000e+00 : f32
    %121 = vector.broadcast %cst_29 : f32 to vector<8x128xf32>
    %122 = arith.addf %121, %120 : vector<8x128xf32>
    %123 = tpu.reciprocal %122 {approx = true} : vector<8x128xf32> -> vector<8x128xf32>
    %124 = arith.mulf %123, %24 : vector<8x128xf32>
    %125 = arith.addf %124, %27 : vector<8x128xf32>
    %126 = vector.extract_strided_slice %125 {offsets = [0, 0], sizes = [8, 32], strides = [1, 1]} : vector<8x128xf32> to vector<8x32xf32>
    %127 = vector.extract_strided_slice %125 {offsets = [0, 32], sizes = [8, 32], strides = [1, 1]} : vector<8x128xf32> to vector<8x32xf32>
    %128 = vector.extract_strided_slice %125 {offsets = [0, 64], sizes = [8, 32], strides = [1, 1]} : vector<8x128xf32> to vector<8x32xf32>
    %129 = vector.extract_strided_slice %125 {offsets = [0, 96], sizes = [8, 32], strides = [1, 1]} : vector<8x128xf32> to vector<8x32xf32>
    %130 = arith.mulf %127, %111 : vector<8x32xf32>
    %131 = arith.mulf %126, %128 : vector<8x32xf32>
    %132 = arith.addf %130, %131 : vector<8x32xf32>
    %133 = math.tanh %132 : vector<8x32xf32>
    %134 = arith.mulf %129, %133 : vector<8x32xf32>
    %135 = vector.extract_strided_slice %15 {offsets = [5, 0, 0], sizes = [1, 8, 128], strides = [1, 1, 1]} : vector<8x8x128xf32> to vector<1x8x128xf32>
    %136 = vector.shape_cast %135 : vector<1x8x128xf32> to vector<8x128xf32>
    %cst_30 = arith.constant dense<0.000000e+00> : vector<8x128xf32>
    %137 = tpu.matmul %134, %4, %cst_30 {dimension_numbers = #tpu.dot_dimension_numbers<[1], [0], [0], [1], [0, 0, 1, 1], [], []>} : vector<8x32xf32>, vector<32x128xf32>, vector<8x128xf32> -> vector<8x128xf32>
    %138 = arith.addf %136, %137 : vector<8x128xf32>
    %cst_31 = arith.constant 0.000000e+00 : f32
    %139 = vector.broadcast %cst_31 : f32 to vector<8x128xf32>
    %140 = arith.subf %139, %138 : vector<8x128xf32>
    %141 = math.exp %140 : vector<8x128xf32>
    %cst_32 = arith.constant 1.000000e+00 : f32
    %142 = vector.broadcast %cst_32 : f32 to vector<8x128xf32>
    %143 = arith.addf %142, %141 : vector<8x128xf32>
    %144 = tpu.reciprocal %143 {approx = true} : vector<8x128xf32> -> vector<8x128xf32>
    %145 = arith.mulf %144, %24 : vector<8x128xf32>
    %146 = arith.addf %145, %27 : vector<8x128xf32>
    %147 = vector.extract_strided_slice %146 {offsets = [0, 0], sizes = [8, 32], strides = [1, 1]} : vector<8x128xf32> to vector<8x32xf32>
    %148 = vector.extract_strided_slice %146 {offsets = [0, 32], sizes = [8, 32], strides = [1, 1]} : vector<8x128xf32> to vector<8x32xf32>
    %149 = vector.extract_strided_slice %146 {offsets = [0, 64], sizes = [8, 32], strides = [1, 1]} : vector<8x128xf32> to vector<8x32xf32>
    %150 = vector.extract_strided_slice %146 {offsets = [0, 96], sizes = [8, 32], strides = [1, 1]} : vector<8x128xf32> to vector<8x32xf32>
    %151 = arith.mulf %148, %132 : vector<8x32xf32>
    %152 = arith.mulf %147, %149 : vector<8x32xf32>
    %153 = arith.addf %151, %152 : vector<8x32xf32>
    %154 = math.tanh %153 : vector<8x32xf32>
    %155 = arith.mulf %150, %154 : vector<8x32xf32>
    %156 = vector.extract_strided_slice %15 {offsets = [6, 0, 0], sizes = [1, 8, 128], strides = [1, 1, 1]} : vector<8x8x128xf32> to vector<1x8x128xf32>
    %157 = vector.shape_cast %156 : vector<1x8x128xf32> to vector<8x128xf32>
    %cst_33 = arith.constant dense<0.000000e+00> : vector<8x128xf32>
    %158 = tpu.matmul %155, %4, %cst_33 {dimension_numbers = #tpu.dot_dimension_numbers<[1], [0], [0], [1], [0, 0, 1, 1], [], []>} : vector<8x32xf32>, vector<32x128xf32>, vector<8x128xf32> -> vector<8x128xf32>
    %159 = arith.addf %157, %158 : vector<8x128xf32>
    %cst_34 = arith.constant 0.000000e+00 : f32
    %160 = vector.broadcast %cst_34 : f32 to vector<8x128xf32>
    %161 = arith.subf %160, %159 : vector<8x128xf32>
    %162 = math.exp %161 : vector<8x128xf32>
    %cst_35 = arith.constant 1.000000e+00 : f32
    %163 = vector.broadcast %cst_35 : f32 to vector<8x128xf32>
    %164 = arith.addf %163, %162 : vector<8x128xf32>
    %165 = tpu.reciprocal %164 {approx = true} : vector<8x128xf32> -> vector<8x128xf32>
    %166 = arith.mulf %165, %24 : vector<8x128xf32>
    %167 = arith.addf %166, %27 : vector<8x128xf32>
    %168 = vector.extract_strided_slice %167 {offsets = [0, 0], sizes = [8, 32], strides = [1, 1]} : vector<8x128xf32> to vector<8x32xf32>
    %169 = vector.extract_strided_slice %167 {offsets = [0, 32], sizes = [8, 32], strides = [1, 1]} : vector<8x128xf32> to vector<8x32xf32>
    %170 = vector.extract_strided_slice %167 {offsets = [0, 64], sizes = [8, 32], strides = [1, 1]} : vector<8x128xf32> to vector<8x32xf32>
    %171 = vector.extract_strided_slice %167 {offsets = [0, 96], sizes = [8, 32], strides = [1, 1]} : vector<8x128xf32> to vector<8x32xf32>
    %172 = arith.mulf %169, %153 : vector<8x32xf32>
    %173 = arith.mulf %168, %170 : vector<8x32xf32>
    %174 = arith.addf %172, %173 : vector<8x32xf32>
    %175 = math.tanh %174 : vector<8x32xf32>
    %176 = arith.mulf %171, %175 : vector<8x32xf32>
    %177 = vector.extract_strided_slice %15 {offsets = [7, 0, 0], sizes = [1, 8, 128], strides = [1, 1, 1]} : vector<8x8x128xf32> to vector<1x8x128xf32>
    %178 = vector.shape_cast %177 : vector<1x8x128xf32> to vector<8x128xf32>
    %cst_36 = arith.constant dense<0.000000e+00> : vector<8x128xf32>
    %179 = tpu.matmul %176, %4, %cst_36 {dimension_numbers = #tpu.dot_dimension_numbers<[1], [0], [0], [1], [0, 0, 1, 1], [], []>} : vector<8x32xf32>, vector<32x128xf32>, vector<8x128xf32> -> vector<8x128xf32>
    %180 = arith.addf %178, %179 : vector<8x128xf32>
    %cst_37 = arith.constant 0.000000e+00 : f32
    %181 = vector.broadcast %cst_37 : f32 to vector<8x128xf32>
    %182 = arith.subf %181, %180 : vector<8x128xf32>
    %183 = math.exp %182 : vector<8x128xf32>
    %cst_38 = arith.constant 1.000000e+00 : f32
    %184 = vector.broadcast %cst_38 : f32 to vector<8x128xf32>
    %185 = arith.addf %184, %183 : vector<8x128xf32>
    %186 = tpu.reciprocal %185 {approx = true} : vector<8x128xf32> -> vector<8x128xf32>
    %187 = arith.mulf %186, %24 : vector<8x128xf32>
    %188 = arith.addf %187, %27 : vector<8x128xf32>
    %189 = vector.extract_strided_slice %188 {offsets = [0, 0], sizes = [8, 32], strides = [1, 1]} : vector<8x128xf32> to vector<8x32xf32>
    %190 = vector.extract_strided_slice %188 {offsets = [0, 32], sizes = [8, 32], strides = [1, 1]} : vector<8x128xf32> to vector<8x32xf32>
    %191 = vector.extract_strided_slice %188 {offsets = [0, 64], sizes = [8, 32], strides = [1, 1]} : vector<8x128xf32> to vector<8x32xf32>
    %192 = vector.extract_strided_slice %188 {offsets = [0, 96], sizes = [8, 32], strides = [1, 1]} : vector<8x128xf32> to vector<8x32xf32>
    %193 = arith.mulf %190, %174 : vector<8x32xf32>
    %194 = arith.mulf %189, %191 : vector<8x32xf32>
    %195 = arith.addf %193, %194 : vector<8x32xf32>
    %196 = math.tanh %195 : vector<8x32xf32>
    %197 = arith.mulf %192, %196 : vector<8x32xf32>
    %cst_39 = arith.constant dense<0.000000e+00> : vector<8x128xf32>
    %198 = tpu.matmul %197, %5, %cst_39 {dimension_numbers = #tpu.dot_dimension_numbers<[1], [0], [0], [1], [0, 0, 1, 1], [], []>} : vector<8x32xf32>, vector<32x128xf32>, vector<8x128xf32> -> vector<8x128xf32>
    %199 = vector.broadcast %2 : vector<1x128xf32> to vector<8x128xf32>
    %200 = arith.addf %198, %199 : vector<8x128xf32>
    %cst_40 = arith.constant 0.000000e+00 : f32
    %201 = vector.broadcast %cst_40 : f32 to vector<8x128xf32>
    %202 = arith.maximumf %200, %201 : vector<8x128xf32>
    %cst_41 = arith.constant dense<0.000000e+00> : vector<8x128xf32>
    %203 = tpu.matmul %202, %6, %cst_41 {dimension_numbers = #tpu.dot_dimension_numbers<[1], [0], [0], [1], [0, 0, 1, 1], [], []>} : vector<8x128xf32>, vector<128x128xf32>, vector<8x128xf32> -> vector<8x128xf32>
    %204 = vector.broadcast %3 : vector<1x128xf32> to vector<8x128xf32>
    %205 = arith.addf %203, %204 : vector<8x128xf32>
    %cst_42 = arith.constant 0.000000e+00 : f32
    %206 = vector.broadcast %cst_42 : f32 to vector<8x128xf32>
    %207 = arith.subf %206, %205 : vector<8x128xf32>
    %208 = math.exp %207 : vector<8x128xf32>
    %cst_43 = arith.constant 1.000000e+00 : f32
    %209 = vector.broadcast %cst_43 : f32 to vector<8x128xf32>
    %210 = arith.addf %209, %208 : vector<8x128xf32>
    %211 = tpu.reciprocal %210 {approx = true} : vector<8x128xf32> -> vector<8x128xf32>
    %c0_44 = arith.constant 0 : index
    %c0_45 = arith.constant 0 : index
    %212 = vector.load %arg3[%c0_44, %c0_45] : memref<8x128xf32, #tpu.memory_space<vmem>>, vector<8x128xf32>
    tpu.vector_store %arg3[%c0_44, %c0_45], %211 {strides = array<i32>} : memref<8x128xf32, #tpu.memory_space<vmem>>, vector<8x128xf32>,
    return
  }
}

</mosaic_0001>

<bundles_post_ra>
// kernel: tpu_custom_call.1
= control target key start
LH: loop header
LB: loop body
LE: loop exit
PB: predicated region body
PF: predicated region fallthrough
CT: control target
= control target key end

     0   :  { %8 = vsyncpa [#allocation3], 0  ;;  %s1807_s0 = inlined_call_operand.hbm [shape: f32[8,8], index: 0, kind: input, shape index: {}]   ;;  %s1808_s1 = inlined_call_operand.hbm [shape: f32[192,128], index: 1, kind: input, shape index: {}]   ;;  %s1809_s2 = inlined_call_operand.vmem [shape: f32[4,128], index: 2, kind: input, shape index: {}]   ;;  %s1810_s3 = inlined_call_operand.hbm [shape: f32[8,128], index: 3, kind: output, shape index: {}]  }
   0x1   :  { %9 = vsyncpa [#allocation6], 0 }
   0x2   :  { %10 = vsyncpa [#allocation4], 0  ;;  %s1553_s12 = smov [#allocation2]   ;;  %s1554_s14 = smov [#allocation5]  }
   0x3   :  { %s17_s13 = sshll.u32 %s1553_s12, 4  ;;  %s26_s15 = sshll.u32 %s1554_s14, 4  ;;  %s18_s13 = int_to_ptr.vmem [resolvable:$true] %s17_s13  ;;  %s1584_s15 = int_to_ptr.vmem [resolvable:$true] %s26_s15 }
   0x4   :  { %s1481_s18 = scalar_lea.hbm %s1807_s0, 128 }
   0x5   :  { %p1482_p0 = scmp.ne.s32.totalorder %s1807_s0, %s1481_s18  ;;  %p1485_p1 = scmp.lt.u32.totalorder %s1481_s18, %s1807_s0 }
   0x7   :  { %p1487_p2 = pnand %p1485_p1, %p1482_p0 }
   0x9   :  { %1490 = shalt.err (!%p1487_p2)
}
   0xa   :  { %s1491_s23 = scalar_lea.vmem %s18_s13, 128  ;;  %p1496_p4 = scmp.lt.s32.totalorder %s18_s13, %s18_s13 }
   0xb   :  { %p1492_p3 = scmp.ne.s32.totalorder %s18_s13, %s1491_s23  ;;  %p1497_p5 = scmp.lt.s32.totalorder %s1491_s23, %s1491_s23 }
   0xd   :  { %p1498_p6 = por %p1497_p5, %p1496_p4 }
   0xf   :  { %p1499_p7 = pnand %p1498_p6, %p1492_p3 }
  0x11   :  { %1502 = shalt.err (!%p1499_p7)
}
  0x12   :  { %20 = dma.hbm_to_vmem [thread:$0]  %s1807_s0, 128, %s18_s13, [#allocation3]  }
  0x13   :  { %s1503_s28 = scalar_lea.hbm %s1808_s1, 3072 }
  0x14   :  { %p1504_p8 = scmp.ne.s32.totalorder %s1808_s1, %s1503_s28  ;;  %p1507_p9 = scmp.lt.u32.totalorder %s1503_s28, %s1808_s1 }
  0x16   :  { %p1509_p10 = pnand %p1507_p9, %p1504_p8 }
  0x18   :  { %1512 = shalt.err (!%p1509_p10)
}
  0x19   :  { %s1513_s6 = scalar_lea.vmem %s1584_s15, 3072  ;;  %p1518_p12 = scmp.lt.s32.totalorder %s1584_s15, %s1584_s15 }
  0x1a   :  { %p1514_p11 = scmp.ne.s32.totalorder %s1584_s15, %s1513_s6  ;;  %p1519_p13 = scmp.lt.s32.totalorder %s1513_s6, %s1513_s6 }
  0x1c   :  { %p1520_p0 = por %p1519_p13, %p1518_p12 }
  0x1e   :  { %p1521_p1 = pnand %p1520_p0, %p1514_p11 }
  0x20   :  { %1524 = shalt.err (!%p1521_p1)
}
  0x21   :  { %s1555_s0 = smov 128   ;;  %s1556_s7 = smov 8  }
  0x22   :  { %32 = dma.hbm_to_vmem [thread:$0]  %s1808_s1, 3072, %s1584_s15, [#allocation6], %s1555_s0, %s1555_s0, %s1556_s7  }
  0x23   :  { %1547 = dma.done.wait [#allocation3], 128  }
  0x24   :  { %1548 = vsyncadd [#allocation3], 4294967168 }
  0x25   :  { %1549 = dma.done.wait [#allocation6], 3072  }
  0x26   :  { %1550 = vsyncadd [#allocation6], 4294964224  ;;  %v70_v0 = vlaneseq  ;;  %v1557_v1 = vmov 0.0|0.0   ;;  %vm1558_vm0 = vmmov 0   ;;  %v1559_v2 = vmov 0.0   ;;  %v45_v5 = vld [vmem:[#allocation5] sm:$0xff] }
  0x27   :  { %1340 = vmatprep.subr.bf16.mxu0 %v1557_v1  ;;  %1214 = vmatprep.mubr.msk.f32.mxu0 %vm1558_vm0, %v1559_v2  ;;  %v46_v6 = vld [vmem:[#allocation5 + $0x8] sm:$0xff]  ;;  %v47_v7 = vld [vmem:[#allocation5 + $0x10] sm:$0xff]  ;;  %v48_v9 = vld [vmem:[#allocation5 + $0x18] sm:$0xff]  ;;  %v1560_v26 = vmov 1.0   ;;  %s1561_s13 = smov 64   ;;  %s1562_s14 = smov 32  }
  0x28   :  { %v1618_v3 = vshrl.u32 %v70_v0, 7  ;;  %1358 = vmatprep.subr.bf16.mxu1 %v1557_v1  ;;  %1247 = vmatprep.mubr.msk.f32.mxu1 %vm1558_vm0, %v1559_v2  ;;  %v1624_v8 = vpack.c.bf16 %v46_v6, %v45_v5  ;;  %v1626_v10 = vld [vmem:[#allocation2] sm:$0xff]  ;;  %v1630_v12 = vpack.c.bf16 %v48_v9, %v47_v7  ;;  %v151_v25 = vand.u32 127, %v70_v0  ;;  %s1563_s19 = smov [#allocation7]  }
  0x29   :  { %v1649_v14 = vld [vmem:[%s1809_s2] ss:$0 sm:$0xff]  ;;  %v1655_v16 = vld [vmem:[%s1809_s2 + $0x1] ss:$0 sm:$0xff]  ;;  %vm157_vm4 = vcmask 261120   ;;  %s1122_s20 = sshll.u32 %s1563_s19, 4  ;;  %s1123_s20 = int_to_ptr.vmem [resolvable:$true] %s1122_s20 }
  0x2a   :  { %v72_v4 = vsub.s32 0, %v1618_v3  ;;  %1342 = vmatpush3.bf16.msra.mxu0 %v1624_v8  ;;  %1360 = vmatpush3.bf16.msra.mxu1 %v1624_v8  ;;  %vm152_vm1 = vcmp.ge.s32.totalorder %v151_v25, 64  ;;  %vm153_vm2 = vcmp.lt.s32.totalorder %v151_v25, 96  ;;  %v79_v38 = vsub.s32 1, %v1618_v3  ;;  %s1525_s21 = scalar_lea.vmem %s1123_s20, 128  ;;  %p1530_p3 = scmp.lt.s32.totalorder %s1123_s20, %s1123_s20 }
  0x2b   :  { %1343 = vmatprep.subr.bf16.mxu0 %v1557_v1  ;;  %1361 = vmatprep.subr.bf16.mxu1 %v1557_v1  ;;  %vm154_vm3 = vmand %vm152_vm1, %vm153_vm2  ;;  %v86_v62 = vsub.s32 2, %v1618_v3  ;;  %p1526_p2 = scmp.ne.s32.totalorder %s1123_s20, %s1525_s21  ;;  %p1531_p4 = scmp.lt.s32.totalorder %s1525_s21, %s1525_s21 }
  0x2c   :  { %v73_v11 = vrot.slane %v1626_v10, %v72_v4  ;;  %v1658_v27 = vsel %vm154_vm3, 2.0, %v1560_v26  ;;  %v1661_v29 = vsel %vm154_vm3, -1.0, %v1559_v2  ;;  %v80_v39 = vrot.slane %v1626_v10, %v79_v38 }
  0x2d   :  { %v87_v63 = vrot.slane %v1626_v10, %v86_v62  ;;  %p1532_p5 = por %p1531_p4, %p1530_p3 }
  0x2e   :  { %75 = vbcast.lane.b32.xlu0 %v73_v11, 256  ;;  %1345 = vmatpush3.bf16.msra.mxu0 %v1630_v12 }
  0x2f   :  { %1363 = vmatpush3.bf16.msra.mxu1 %v1630_v12  ;;  %1346 = vmatprep.subr.bf16.mxu0 %v1557_v1  ;;  %p1533_p6 = pnand %p1532_p5, %p1526_p2 }
  0x30   :  { %1370 = vmatprep.subr.bf16.mxu1 %v1557_v1 }
  0x31   :  { %1215 = vmatmul.mubr.f32.vlgmr.msra.gmra.mrb[0].mxu0 %v1559_v2 }
  0x32   :  { %1348 = vmatpush3.bf16.msra.mxu0 %v1624_v8  ;;  %1225 = vmatprep.mubr.msk.f32.mxu0 %vm1558_vm0, %v1559_v2 }
  0x33   :  { %1349 = vmatprep.subr.bf16.mxu0 %v1557_v1 }
  0x36   :  { %1351 = vmatpush3.bf16.msra.mxu0 %v1630_v12 }
  0x37   :  { %1352 = vmatprep.subr.bf16.mxu0 %v1557_v1 }
  0xa0   :  { %v76_v13 = vpop.permute.xlu0 %75 }
  0xa1   :  { %v130_v15 = vmul.f32 %v1649_v14, %v76_v13 }
  0xa3   :  { %v142_v17 = vadd.f32 %v1655_v16, %v130_v15 }
 0x104   :  { %v227_v18 = vpop.f32.mrb[0].mxu0 }
 0x105   :  { %v231_v19 = vadd.f32 %v227_v18, %v142_v17  ;;  %v1216_v20 = vpop.f32.mrb[1].mxu0 }
 0x107   :  { %v232_v21 = vsub.f32 0.0, %v231_v19 }
 0x109   :  { %v233_v22 = vmul.f32 1.442695, %v232_v21 }
 0x10b   :  { %1429 = vpow2.f32 %v233_v22 }
 0x115   :  { %v1430_v23 = vpop.eup %1429 }
 0x116   :  { %v235_v24 = vadd.f32 1.0, %v1430_v23 }
 0x118   :  { %1431 = vrcp.f32 %v235_v24 }
 0x122   :  { %v1432_v28 = vpop.eup %1431 }
 0x123   :  { %v237_v30 = vmul.f32 %v1432_v28, %v1658_v27 }
 0x125   :  { %v238_v31 = vadd.f32 %v237_v30, %v1661_v29 }
 0x127   :  { %241 = vrot.lane.b32.xlu0 %v238_v31, %s1561_s13  ;;  %v239_v34 = vmul.f32 0.0, %v238_v31 }
 0x199   :  { %v242_v32 = vpop.permute.xlu0 %241 }
 0x19a   :  { %v244_v33 = vmul.f32 %v242_v32, %v238_v31  ;;  %v93_v32 = vsub.s32 3, %v1618_v3 }
 0x19c   :  { %246 = vrot.lane.b32.xlu1 %v244_v33, %s1562_s14  ;;  %v94_v33 = vrot.slane %v1626_v10, %v93_v32 }
 0x20e   :  { %v247_v35 = vpop.permute.xlu1 %246 }
 0x20f   :  { %v249_v36 = vadd.f32 %v247_v35, %v239_v34 }
 0x211   :  { %1433 = vtanh.f32 %v249_v36 }
 0x21b   :  { %v1434_v37 = vpop.eup %1433 }
 0x21c   :  { %252 = vrot.lane.b32.xlu1 %v1434_v37, %s1561_s13 }
 0x220   :  { %82 = vbcast.lane.b32.xlu1 %v80_v39, 256 }
 0x28e   :  { %v253_v40 = vpop.permute.xlu1 %252 }
 0x28f   :  { %v255_v41 = vmul.f32 %v253_v40, %v238_v31 }
 0x291   :  { %257 = vrot.lane.b32.xlu0 %v255_v41, %s1562_s14 }
 0x292   :  { %v83_v43 = vpop.permute.xlu1 %82 }
 0x293   :  { %v131_v44 = vmul.f32 %v1649_v14, %v83_v43 }
 0x295   :  { %v143_v45 = vadd.f32 %v1655_v16, %v131_v44 }
 0x303   :  { %v258_v42 = vpop.permute.xlu0 %257 }
 0x304   :  { %1226 = vmatmul.mubr.msk.f32.vlgmr.msra.gmra.mrb[2].mxu0 %vm157_vm4, %v258_v42 }
 0x305   :  { %1354 = vmatpush3.bf16.msra.mxu0 %v1624_v8  ;;  %1236 = vmatprep.mubr.msk.f32.mxu0 %vm1558_vm0, %v1559_v2 }
 0x306   :  { %1355 = vmatprep.subr.bf16.mxu0 %v1557_v1 }
 0x309   :  { %1357 = vmatpush3.bf16.msra.mxu0 %v1630_v12 }
 0x30a   :  { %1364 = vmatprep.subr.bf16.mxu0 %v1557_v1 }
 0x3d7   :  { %v327_v46 = vpop.f32.mrb[2].mxu0 }
 0x3d8   :  { %v331_v47 = vadd.f32 %v327_v46, %v143_v45  ;;  %v1227_v48 = vpop.f32.mrb[3].mxu0 }
 0x3da   :  { %v332_v49 = vsub.f32 0.0, %v331_v47 }
 0x3dc   :  { %v333_v50 = vmul.f32 1.442695, %v332_v49 }
 0x3de   :  { %1435 = vpow2.f32 %v333_v50 }
 0x3e8   :  { %v1436_v51 = vpop.eup %1435 }
 0x3e9   :  { %v335_v52 = vadd.f32 1.0, %v1436_v51 }
 0x3eb   :  { %1437 = vrcp.f32 %v335_v52 }
 0x3f5   :  { %v1438_v53 = vpop.eup %1437 }
 0x3f6   :  { %v337_v54 = vmul.f32 %v1438_v53, %v1658_v27 }
 0x3f8   :  { %v338_v55 = vadd.f32 %v337_v54, %v1661_v29 }
 0x3fa   :  { %341 = vrot.lane.b32.xlu0 %v338_v55, %s1561_s13  ;;  %v339_v58 = vmul.f32 %v338_v55, %v249_v36 }
 0x46c   :  { %v342_v56 = vpop.permute.xlu0 %341 }
 0x46d   :  { %v344_v57 = vmul.f32 %v342_v56, %v338_v55  ;;  %v100_v56 = vsub.s32 4, %v1618_v3 }
 0x46f   :  { %346 = vrot.lane.b32.xlu1 %v344_v57, %s1562_s14  ;;  %v101_v57 = vrot.slane %v1626_v10, %v100_v56 }
 0x4e1   :  { %v347_v59 = vpop.permute.xlu1 %346 }
 0x4e2   :  { %v349_v60 = vadd.f32 %v347_v59, %v339_v58 }
 0x4e4   :  { %1439 = vtanh.f32 %v349_v60 }
 0x4ee   :  { %v1440_v61 = vpop.eup %1439 }
 0x4ef   :  { %352 = vrot.lane.b32.xlu0 %v1440_v61, %s1561_s13 }
 0x4f3   :  { %89 = vbcast.lane.b32.xlu0 %v87_v63, 256 }
 0x561   :  { %v353_v0 = vpop.permute.xlu0 %352 }
 0x562   :  { %v355_v4 = vmul.f32 %v353_v0, %v338_v55 }
 0x564   :  { %357 = vrot.lane.b32.xlu1 %v355_v4, %s1562_s14 }
 0x565   :  { %v90_v6 = vpop.permute.xlu0 %89 }
 0x566   :  { %v132_v7 = vmul.f32 %v1649_v14, %v90_v6 }
 0x568   :  { %v144_v9 = vadd.f32 %v1655_v16, %v132_v7 }
 0x5d6   :  { %v358_v5 = vpop.permute.xlu1 %357 }
 0x5d7   :  { %1237 = vmatmul.mubr.msk.f32.vlgmr.msra.gmra.mrb[4].mxu0 %vm157_vm4, %v358_v5 }
 0x5d8   :  { %1366 = vmatpush3.bf16.msra.mxu0 %v1624_v8  ;;  %1258 = vmatprep.mubr.msk.f32.mxu0 %vm1558_vm0, %v1559_v2 }
 0x5d9   :  { %1367 = vmatprep.subr.bf16.mxu0 %v1557_v1 }
 0x5dc   :  { %1369 = vmatpush3.bf16.msra.mxu0 %v1630_v12 }
 0x5dd   :  { %1376 = vmatprep.subr.bf16.mxu0 %v1557_v1 }
 0x6aa   :  { %v427_v11 = vpop.f32.mrb[4].mxu0 }
 0x6ab   :  { %v431_v13 = vadd.f32 %v427_v11, %v144_v9  ;;  %v1238_v15 = vpop.f32.mrb[5].mxu0 }
 0x6ad   :  { %v432_v17 = vsub.f32 0.0, %v431_v13 }
 0x6af   :  { %v433_v18 = vmul.f32 1.442695, %v432_v17 }
 0x6b1   :  { %1441 = vpow2.f32 %v433_v18 }
 0x6bb   :  { %v1442_v19 = vpop.eup %1441 }
 0x6bc   :  { %v435_v20 = vadd.f32 1.0, %v1442_v19 }
 0x6be   :  { %1443 = vrcp.f32 %v435_v20 }
 0x6c8   :  { %v1444_v21 = vpop.eup %1443 }
 0x6c9   :  { %v437_v22 = vmul.f32 %v1444_v21, %v1658_v27 }
 0x6cb   :  { %v438_v23 = vadd.f32 %v437_v22, %v1661_v29 }
 0x6cd   :  { %441 = vrot.lane.b32.xlu1 %v438_v23, %s1561_s13  ;;  %v439_v26 = vmul.f32 %v438_v23, %v349_v60 }
 0x73f   :  { %v442_v24 = vpop.permute.xlu1 %441 }
 0x740   :  { %v444_v25 = vmul.f32 %v442_v24, %v438_v23  ;;  %v107_v24 = vsub.s32 5, %v1618_v3 }
 0x742   :  { %446 = vrot.lane.b32.xlu0 %v444_v25, %s1562_s14  ;;  %v108_v25 = vrot.slane %v1626_v10, %v107_v24 }
 0x7b4   :  { %v447_v28 = vpop.permute.xlu0 %446 }
 0x7b5   :  { %v449_v30 = vadd.f32 %v447_v28, %v439_v26 }
 0x7b7   :  { %1445 = vtanh.f32 %v449_v30 }
 0x7c1   :  { %v1446_v31 = vpop.eup %1445 }
 0x7c2   :  { %452 = vrot.lane.b32.xlu1 %v1446_v31, %s1561_s13 }
 0x7c6   :  { %96 = vbcast.lane.b32.xlu1 %v94_v33, 256 }
 0x834   :  { %v453_v34 = vpop.permute.xlu1 %452 }
 0x835   :  { %v455_v35 = vmul.f32 %v453_v34, %v438_v23 }
 0x837   :  { %457 = vrot.lane.b32.xlu0 %v455_v35, %s1562_s14 }
 0x838   :  { %v97_v37 = vpop.permute.xlu1 %96 }
 0x839   :  { %v133_v38 = vmul.f32 %v1649_v14, %v97_v37 }
 0x83b   :  { %v145_v39 = vadd.f32 %v1655_v16, %v133_v38 }
 0x8a9   :  { %v458_v36 = vpop.permute.xlu0 %457 }
 0x8aa   :  { %1248 = vmatmul.mubr.msk.f32.vlgmr.msra.gmra.mrb[0].mxu1 %vm157_vm4, %v458_v36 }
 0x8ab   :  { %1372 = vmatpush3.bf16.msra.mxu1 %v1624_v8  ;;  %1269 = vmatprep.mubr.msk.f32.mxu1 %vm1558_vm0, %v1559_v2 }
 0x8ac   :  { %1373 = vmatprep.subr.bf16.mxu1 %v1557_v1 }
 0x8af   :  { %1375 = vmatpush3.bf16.msra.mxu1 %v1630_v12 }
 0x8b0   :  { %1382 = vmatprep.subr.bf16.mxu1 %v1557_v1 }
 0x97d   :  { %v527_v40 = vpop.f32.mrb[0].mxu1 }
 0x97e   :  { %v531_v41 = vadd.f32 %v527_v40, %v145_v39  ;;  %v1249_v42 = vpop.f32.mrb[1].mxu1 }
 0x980   :  { %v532_v43 = vsub.f32 0.0, %v531_v41 }
 0x982   :  { %v533_v44 = vmul.f32 1.442695, %v532_v43 }
 0x984   :  { %1447 = vpow2.f32 %v533_v44 }
 0x98e   :  { %v1448_v45 = vpop.eup %1447 }
 0x98f   :  { %v535_v46 = vadd.f32 1.0, %v1448_v45 }
 0x991   :  { %1449 = vrcp.f32 %v535_v46 }
 0x99b   :  { %v1450_v47 = vpop.eup %1449 }
 0x99c   :  { %v537_v48 = vmul.f32 %v1450_v47, %v1658_v27 }
 0x99e   :  { %v538_v49 = vadd.f32 %v537_v48, %v1661_v29  ;;  %v114_v48 = vsub.s32 6, %v1618_v3 }
 0x9a0   :  { %541 = vrot.lane.b32.xlu0 %v538_v49, %s1561_s13  ;;  %v539_v52 = vmul.f32 %v538_v49, %v449_v30 }
 0xa12   :  { %v542_v50 = vpop.permute.xlu0 %541 }
 0xa13   :  { %v544_v51 = vmul.f32 %v542_v50, %v538_v49 }
 0xa15   :  { %546 = vrot.lane.b32.xlu1 %v544_v51, %s1562_s14 }
 0xa87   :  { %v547_v53 = vpop.permute.xlu1 %546 }
 0xa88   :  { %v549_v54 = vadd.f32 %v547_v53, %v539_v52 }
 0xa8a   :  { %1451 = vtanh.f32 %v549_v54 }
 0xa94   :  { %v1452_v55 = vpop.eup %1451 }
 0xa95   :  { %552 = vrot.lane.b32.xlu0 %v1452_v55, %s1561_s13 }
 0xa99   :  { %103 = vbcast.lane.b32.xlu0 %v101_v57, 256 }
 0xb07   :  { %v553_v58 = vpop.permute.xlu0 %552 }
 0xb08   :  { %v555_v59 = vmul.f32 %v553_v58, %v538_v49  ;;  %v115_v49 = vrot.slane %v1626_v10, %v114_v48  ;;  %v59_v48 = vld [vmem:[#allocation5 + $0x70] sm:$0xff] }
 0xb0a   :  { %557 = vrot.lane.b32.xlu1 %v555_v59, %s1562_s14 }
 0xb0b   :  { %v104_v61 = vpop.permute.xlu0 %103 }
 0xb0c   :  { %v134_v62 = vmul.f32 %v1649_v14, %v104_v61 }
 0xb0e   :  { %v146_v63 = vadd.f32 %v1655_v16, %v134_v62 }
 0xb7c   :  { %v558_v60 = vpop.permute.xlu1 %557 }
 0xb7d   :  { %1259 = vmatmul.mubr.msk.f32.vlgmr.msra.gmra.mrb[6].mxu0 %vm157_vm4, %v558_v60 }
 0xb7e   :  { %1378 = vmatpush3.bf16.msra.mxu0 %v1624_v8  ;;  %1280 = vmatprep.mubr.msk.f32.mxu0 %vm1558_vm0, %v1559_v2 }
 0xb7f   :  { %1379 = vmatprep.subr.bf16.mxu0 %v1557_v1 }
 0xb82   :  { %1381 = vmatpush3.bf16.msra.mxu0 %v1630_v12 }
 0xb83   :  { %1388 = vmatprep.subr.bf16.mxu0 %v1557_v1 }
 0xc50   :  { %v627_v0 = vpop.f32.mrb[6].mxu0 }
 0xc51   :  { %v631_v4 = vadd.f32 %v627_v0, %v146_v63  ;;  %v1260_v5 = vpop.f32.mrb[7].mxu0 }
 0xc53   :  { %v632_v6 = vsub.f32 0.0, %v631_v4 }
 0xc55   :  { %v633_v7 = vmul.f32 1.442695, %v632_v6 }
 0xc57   :  { %1453 = vpow2.f32 %v633_v7 }
 0xc61   :  { %v1454_v9 = vpop.eup %1453 }
 0xc62   :  { %v635_v11 = vadd.f32 1.0, %v1454_v9 }
 0xc64   :  { %1455 = vrcp.f32 %v635_v11 }
 0xc6e   :  { %v1456_v13 = vpop.eup %1455 }
 0xc6f   :  { %v637_v15 = vmul.f32 %v1456_v13, %v1658_v27 }
 0xc71   :  { %v638_v17 = vadd.f32 %v637_v15, %v1661_v29  ;;  %v121_v15 = vsub.s32 7, %v1618_v3 }
 0xc73   :  { %641 = vrot.lane.b32.xlu1 %v638_v17, %s1561_s13  ;;  %v639_v20 = vmul.f32 %v638_v17, %v549_v54 }
 0xce5   :  { %v642_v18 = vpop.permute.xlu1 %641 }
 0xce6   :  { %v644_v19 = vmul.f32 %v642_v18, %v638_v17 }
 0xce8   :  { %646 = vrot.lane.b32.xlu0 %v644_v19, %s1562_s14 }
 0xd5a   :  { %v647_v21 = vpop.permute.xlu0 %646 }
 0xd5b   :  { %v649_v22 = vadd.f32 %v647_v21, %v639_v20 }
 0xd5d   :  { %1457 = vtanh.f32 %v649_v22 }
 0xd67   :  { %v1458_v23 = vpop.eup %1457 }
 0xd68   :  { %652 = vrot.lane.b32.xlu1 %v1458_v23, %s1561_s13 }
 0xd6c   :  { %110 = vbcast.lane.b32.xlu1 %v108_v25, 256 }
 0xdda   :  { %v653_v26 = vpop.permute.xlu1 %652 }
 0xddb   :  { %v655_v28 = vmul.f32 %v653_v26, %v638_v17  ;;  %v122_v17 = vrot.slane %v1626_v10, %v121_v15 }
 0xddd   :  { %657 = vrot.lane.b32.xlu0 %v655_v28, %s1562_s14 }
 0xdde   :  { %v111_v31 = vpop.permute.xlu1 %110 }
 0xddf   :  { %v135_v32 = vmul.f32 %v1649_v14, %v111_v31 }
 0xde1   :  { %v147_v33 = vadd.f32 %v1655_v16, %v135_v32 }
 0xe4f   :  { %v658_v30 = vpop.permute.xlu0 %657 }
 0xe50   :  { %1270 = vmatmul.mubr.msk.f32.vlgmr.msra.gmra.mrb[2].mxu1 %vm157_vm4, %v658_v30 }
 0xe51   :  { %1384 = vmatpush3.bf16.msra.mxu1 %v1624_v8  ;;  %1291 = vmatprep.mubr.msk.f32.mxu1 %vm1558_vm0, %v1559_v2 }
 0xe52   :  { %1385 = vmatprep.subr.bf16.mxu1 %v1557_v1 }
 0xe55   :  { %1387 = vmatpush3.bf16.msra.mxu1 %v1630_v12 }
 0xe56   :  { %1394 = vmatprep.subr.bf16.mxu1 %v1557_v1 }
 0xf23   :  { %v727_v34 = vpop.f32.mrb[2].mxu1 }
 0xf24   :  { %v731_v35 = vadd.f32 %v727_v34, %v147_v33  ;;  %v1271_v36 = vpop.f32.mrb[3].mxu1 }
 0xf25   :  { %v49_v36 = vld [vmem:[#allocation5 + $0x20] sm:$0xff] }
 0xf26   :  { %v732_v37 = vsub.f32 0.0, %v731_v35 }
 0xf28   :  { %v733_v38 = vmul.f32 1.442695, %v732_v37  ;;  %v50_v37 = vld [vmem:[#allocation5 + $0x28] sm:$0xff] }
 0xf2a   :  { %1459 = vpow2.f32 %v733_v38  ;;  %v51_v38 = vld [vmem:[#allocation5 + $0x30] sm:$0xff] }
 0xf34   :  { %v1460_v8 = vpop.eup %1459 }
 0xf35   :  { %v735_v39 = vadd.f32 1.0, %v1460_v8  ;;  %v1389_v8 = vpack.c.bf16 %v50_v37, %v49_v36 }
 0xf37   :  { %1461 = vrcp.f32 %v735_v39  ;;  %v52_v39 = vld [vmem:[#allocation5 + $0x38] sm:$0xff] }
 0xf41   :  { %v1462_v40 = vpop.eup %1461 }
 0xf42   :  { %v737_v41 = vmul.f32 %v1462_v40, %v1658_v27  ;;  %v1392_v40 = vpack.c.bf16 %v52_v39, %v51_v38 }
 0xf44   :  { %v738_v12 = vadd.f32 %v737_v41, %v1661_v29  ;;  %v54_v41 = vld [vmem:[#allocation5 + $0x48] sm:$0xff] }
 0xf46   :  { %741 = vrot.lane.b32.xlu0 %v738_v12, %s1561_s13  ;;  %v739_v44 = vmul.f32 %v738_v12, %v649_v22 }
 0xfb8   :  { %v742_v42 = vpop.permute.xlu0 %741 }
 0xfb9   :  { %v744_v43 = vmul.f32 %v742_v42, %v738_v12 }
 0xfbb   :  { %746 = vrot.lane.b32.xlu1 %v744_v43, %s1562_s14  ;;  %v56_v43 = vld [vmem:[#allocation5 + $0x58] sm:$0xff] }
0x102d   :  { %v747_v45 = vpop.permute.xlu1 %746 }
0x102e   :  { %v749_v46 = vadd.f32 %v747_v45, %v739_v44  ;;  %v57_v45 = vld [vmem:[#allocation5 + $0x60] sm:$0xff] }
0x1030   :  { %1463 = vtanh.f32 %v749_v46 }
0x103a   :  { %v1464_v47 = vpop.eup %1463 }
0x103b   :  { %752 = vrot.lane.b32.xlu0 %v1464_v47, %s1561_s13 }
0x103f   :  { %117 = vbcast.lane.b32.xlu0 %v115_v49, 256  ;;  %v60_v49 = vld [vmem:[#allocation5 + $0x78] sm:$0xff] }
0x10ad   :  { %v753_v50 = vpop.permute.xlu0 %752 }
0x10ae   :  { %v755_v51 = vmul.f32 %v753_v50, %v738_v12  ;;  %v55_v12 = vld [vmem:[#allocation5 + $0x50] sm:$0xff] }
0x10af   :  { %v1398_v44 = vpack.c.bf16 %v56_v43, %v55_v12 }
0x10b0   :  { %757 = vrot.lane.b32.xlu1 %v755_v51, %s1562_s14 }
0x10b1   :  { %v118_v53 = vpop.permute.xlu0 %117 }
0x10b2   :  { %v136_v54 = vmul.f32 %v1649_v14, %v118_v53  ;;  %v61_v53 = vld [vmem:[#allocation5 + $0x80] sm:$0xff] }
0x10b4   :  { %v148_v55 = vadd.f32 %v1655_v16, %v136_v54  ;;  %v62_v54 = vld [vmem:[#allocation5 + $0x88] sm:$0xff] }
0x1122   :  { %v758_v52 = vpop.permute.xlu1 %757 }
0x1123   :  { %1281 = vmatmul.mubr.msk.f32.vlgmr.msra.gmra.mrb[8].mxu0 %vm157_vm4, %v758_v52  ;;  %v1404_v52 = vpack.c.bf16 %v60_v49, %v59_v48 }
0x1124   :  { %1302 = vmatprep.mubr.msk.f32.mxu0 %vm1558_vm0, %v1559_v2  ;;  %1390 = vmatpush3.bf16.msra.mxu0 %v1389_v8 }
0x1125   :  { %1391 = vmatprep.subr.bf16.mxu0 %v1557_v1 }
0x1128   :  { %1393 = vmatpush3.bf16.msra.mxu0 %v1392_v40 }
0x11f6   :  { %v827_v56 = vpop.f32.mrb[8].mxu0 }
0x11f7   :  { %v831_v57 = vadd.f32 %v827_v56, %v148_v55  ;;  %v1282_v58 = vpop.f32.mrb[9].mxu0  ;;  %v1407_v55 = vpack.c.bf16 %v62_v54, %v61_v53  ;;  %v63_v56 = vld [vmem:[#allocation5 + $0x90] sm:$0xff] }
0x11f9   :  { %v832_v59 = vsub.f32 0.0, %v831_v57  ;;  %v64_v57 = vld [vmem:[#allocation5 + $0x98] sm:$0xff] }
0x11fa   :  { %v1410_v58 = vpack.c.bf16 %v64_v57, %v63_v56 }
0x11fb   :  { %v833_v60 = vmul.f32 1.442695, %v832_v59  ;;  %v65_v59 = vld [vmem:[#allocation5 + $0xa0] sm:$0xff] }
0x11fd   :  { %1465 = vpow2.f32 %v833_v60  ;;  %v66_v60 = vld [vmem:[#allocation5 + $0xa8] sm:$0xff] }
0x1207   :  { %v1466_v61 = vpop.eup %1465 }
0x1208   :  { %v835_v62 = vadd.f32 1.0, %v1466_v61  ;;  %v1413_v61 = vpack.c.bf16 %v66_v60, %v65_v59 }
0x120a   :  { %1467 = vrcp.f32 %v835_v62 }
0x1214   :  { %v1468_v63 = vpop.eup %1467 }
0x1215   :  { %v837_v0 = vmul.f32 %v1468_v63, %v1658_v27  ;;  %v67_v63 = vld [vmem:[#allocation5 + $0xb0] sm:$0xff] }
0x1217   :  { %v838_v4 = vadd.f32 %v837_v0, %v1661_v29  ;;  %v68_v0 = vld [vmem:[#allocation5 + $0xb8] sm:$0xff] }
0x1219   :  { %841 = vrot.lane.b32.xlu1 %v838_v4, %s1561_s13  ;;  %v839_v7 = vmul.f32 %v838_v4, %v749_v46  ;;  %v58_v46 = vld [vmem:[#allocation5 + $0x68] sm:$0xff] }
0x121a   :  { %v1401_v47 = vpack.c.bf16 %v58_v46, %v57_v45 }
0x128b   :  { %v842_v5 = vpop.permute.xlu1 %841 }
0x128c   :  { %v844_v6 = vmul.f32 %v842_v5, %v838_v4  ;;  %v1141_v5 = vld [vmem:[%s1809_s2 + $0x2] ss:$0 sm:$0xff] }
0x128e   :  { %846 = vrot.lane.b32.xlu0 %v844_v6, %s1562_s14 }
0x1300   :  { %v847_v9 = vpop.permute.xlu0 %846 }
0x1301   :  { %v849_v11 = vadd.f32 %v847_v9, %v839_v7 }
0x1303   :  { %1469 = vtanh.f32 %v849_v11 }
0x130d   :  { %v1470_v13 = vpop.eup %1469 }
0x130e   :  { %852 = vrot.lane.b32.xlu1 %v1470_v13, %s1561_s13 }
0x1312   :  { %124 = vbcast.lane.b32.xlu1 %v122_v17, 256 }
0x1380   :  { %v853_v18 = vpop.permute.xlu1 %852 }
0x1381   :  { %v855_v19 = vmul.f32 %v853_v18, %v838_v4  ;;  %v1416_v4 = vpack.c.bf16 %v68_v0, %v67_v63 }
0x1383   :  { %857 = vrot.lane.b32.xlu0 %v855_v19, %s1562_s14 }
0x1384   :  { %v125_v21 = vpop.permute.xlu1 %124 }
0x1385   :  { %v137_v22 = vmul.f32 %v1649_v14, %v125_v21 }
0x1387   :  { %v149_v23 = vadd.f32 %v1655_v16, %v137_v22 }
0x13f5   :  { %v858_v20 = vpop.permute.xlu0 %857 }
0x13f6   :  { %1292 = vmatmul.mubr.msk.f32.vlgmr.msra.gmra.mrb[4].mxu1 %vm157_vm4, %v858_v20 }
0x13f7   :  { %1337 = vmatprep.mubr.msk.f32.mxu1 %vm1558_vm0, %v1559_v2 }
0x14c9   :  { %v927_v24 = vpop.f32.mrb[4].mxu1 }
0x14ca   :  { %v931_v3 = vadd.f32 %v927_v24, %v149_v23  ;;  %v1293_v25 = vpop.f32.mrb[5].mxu1 }
0x14cc   :  { %v932_v10 = vsub.f32 0.0, %v931_v3 }
0x14ce   :  { %v933_v26 = vmul.f32 1.442695, %v932_v10 }
0x14d0   :  { %1471 = vpow2.f32 %v933_v26 }
0x14da   :  { %v1472_v28 = vpop.eup %1471 }
0x14db   :  { %v935_v30 = vadd.f32 1.0, %v1472_v28 }
0x14dd   :  { %1473 = vrcp.f32 %v935_v30 }
0x14e7   :  { %v1474_v31 = vpop.eup %1473 }
0x14e8   :  { %v937_v32 = vmul.f32 %v1474_v31, %v1658_v27 }
0x14ea   :  { %v938_v33 = vadd.f32 %v937_v32, %v1661_v29  ;;  %v53_v29 = vld [vmem:[#allocation5 + $0x40] sm:$0xff] }
0x14eb   :  { %v1395_v42 = vpack.c.bf16 %v54_v41, %v53_v29 }
0x14ec   :  { %941 = vrot.lane.b32.xlu0 %v938_v33, %s1561_s13  ;;  %v939_v16 = vmul.f32 %v938_v33, %v849_v11 }
0x14ed   :  { %1396 = vmatpush3.bf16.msra.mxu1 %v1395_v42 }
0x14ee   :  { %1397 = vmatprep.subr.bf16.mxu1 %v1557_v1 }
0x14f1   :  { %1399 = vmatpush3.bf16.msra.mxu1 %v1398_v44 }
0x14f2   :  { %1400 = vmatprep.subr.bf16.mxu1 %v1557_v1 }
0x14f5   :  { %1402 = vmatpush3.bf16.msra.mxu1 %v1401_v47 }
0x14f6   :  { %1403 = vmatprep.subr.bf16.mxu1 %v1557_v1 }
0x14f9   :  { %1405 = vmatpush3.bf16.msra.mxu1 %v1404_v52 }
0x14fa   :  { %1406 = vmatprep.subr.bf16.mxu1 %v1557_v1 }
0x14fd   :  { %1408 = vmatpush3.bf16.msra.mxu1 %v1407_v55 }
0x14fe   :  { %1409 = vmatprep.subr.bf16.mxu1 %v1557_v1 }
0x1501   :  { %1411 = vmatpush3.bf16.msra.mxu1 %v1410_v58 }
0x1502   :  { %1412 = vmatprep.subr.bf16.mxu1 %v1557_v1 }
0x1505   :  { %1414 = vmatpush3.bf16.msra.mxu1 %v1413_v61 }
0x1506   :  { %1415 = vmatprep.subr.bf16.mxu1 %v1557_v1  ;;  %v1143_v1 = vld [vmem:[%s1809_s2 + $0x3] ss:$0 sm:$0xff] }
0x1509   :  { %1417 = vmatpush3.bf16.msra.mxu1 %v1416_v4 }
0x155e   :  { %v942_v2 = vpop.permute.xlu0 %941 }
0x155f   :  { %v944_v14 = vmul.f32 %v942_v2, %v938_v33 }
0x1561   :  { %946 = vrot.lane.b32.xlu1 %v944_v14, %s1562_s14 }
0x15d3   :  { %v947_v34 = vpop.permute.xlu1 %946 }
0x15d4   :  { %v949_v35 = vadd.f32 %v947_v34, %v939_v16 }
0x15d6   :  { %1475 = vtanh.f32 %v949_v35 }
0x15e0   :  { %v1476_v27 = vpop.eup %1475 }
0x15e1   :  { %952 = vrot.lane.b32.xlu0 %v1476_v27, %s1561_s13 }
0x1653   :  { %v953_v50 = vpop.permute.xlu0 %952 }
0x1654   :  { %v955_v51 = vmul.f32 %v953_v50, %v938_v33 }
0x1656   :  { %961 = vrot.lane.b32.xlu1 %v955_v51, %s1562_s14 }
0x16c8   :  { %v962_v62 = vpop.permute.xlu1 %961 }
0x16c9   :  { %1303 = vmatmul.mubr.msk.f32.vlgmr.msra.gmra.mrb[10].mxu0 %vm157_vm4, %v962_v62 }
0x179c   :  { %v1031_v6 = vpop.f32.mrb[10].mxu0 }
0x179d   :  { %v1032_v7 = vadd.f32 %v1141_v5, %v1031_v6  ;;  %v1304_v9 = vpop.f32.mrb[11].mxu0 }
0x179f   :  { %v1035_v11 = vmax.f32 %v1032_v7, 0.0 }
0x17a1   :  { %1338 = vmatmul.mubr.f32.vlgmr.msra.gmra.mrb[6].mxu1 %v1035_v11 }
0x1874   :  { %v1106_v13 = vpop.f32.mrb[6].mxu1 }
0x1875   :  { %v1107_v15 = vadd.f32 %v1143_v1, %v1106_v13  ;;  %v1339_v17 = vpop.f32.mrb[7].mxu1 }
0x1877   :  { %v1110_v18 = vsub.f32 0.0, %v1107_v15 }
0x1879   :  { %v1111_v19 = vmul.f32 1.442695, %v1110_v18 }
0x187b   :  { %1477 = vpow2.f32 %v1111_v19 }
0x1885   :  { %v1478_v20 = vpop.eup %1477 }
0x1886   :  { %v1113_v21 = vadd.f32 1.0, %v1478_v20 }
0x1888   :  { %1479 = vrcp.f32 %v1113_v21 }
0x1892   :  { %v1480_v22 = vpop.eup %1479 }
0x1893   :  { %1115 = vst [vmem:[#allocation7] sm:$0xff] %v1480_v22 }
0x1894   :  { %1536 = shalt.err (!%p1533_p6)
}
0x1895   :  { %s1537_s23 = scalar_lea.hbm %s1810_s3, 128 }
0x1896   :  { %p1538_p7 = scmp.ne.s32.totalorder %s1810_s3, %s1537_s23  ;;  %p1541_p8 = scmp.lt.u32.totalorder %s1537_s23, %s1810_s3 }
0x1898   :  { %p1543_p9 = pnand %p1541_p8, %p1538_p7 }
0x189a   :  { %1546 = shalt.err (!%p1543_p9)
}
0x189b   :  { %1125 = dma.vmem_to_hbm [thread:$0]  %s1123_s20, 128, %s1810_s3, [#allocation4]  }
0x189c   :  { %1551 = dma.done.wait [#allocation4], 128  }
0x189d   :  { %1552 = vsyncadd [#allocation4], 4294967168 }
0x189e   :  { %1129 = vsyncpa [#allocation3], 1 }
0x189f   :  { %1130 = vsyncpa [#allocation6], 1 }
0x18a0   :  { %1131 = vsyncpa [#allocation4], 1 }

</bundles_post_ra>
